<compile_context>
chip_gen: v7x
topology: tpu7x:2x2x1
jax: 0.10.0
libtpu: 0.0.40
codegen_flags: <defaults>
</compile_context>

<pallas_src>
import functools

import jax
import jax.numpy as jnp
from jax import lax
from jax.experimental import pallas as pl
from jax.experimental.pallas import tpu as pltpu


def _round_up(x, m):
    return ((x + m - 1) // m) * m


def _tpu_generation():
    try:
        kind = jax.devices()[0].device_kind.lower()
    except Exception:
        return "unknown"
    if "v5 lite" in kind or "v5e" in kind or "v5lite" in kind:
        return "v5e"
    if "v6" in kind:
        return "v6e"
    if "v7" in kind or "7x" in kind:
        return "v7x"
    return "unknown"


def _pick_tm(n, d, sub, cap):
    """Row tile: minimise output writes + column-operand re-streaming."""
    best_tm, best_cost = sub, None
    for cand in (1024, 768, 512, 384, 256, 128, 64, 32, 16, 8):
        if cand > max(cap, sub) or cand % sub:
            continue
        np_ = _round_up(max(n, 1), cand)
        cost = np_ * (cand + d) / cand
        if best_cost is None or cost < best_cost - 1e-9:
            best_cost, best_tm = cost, cand
    return best_tm


def _pick_tn(col_sizes, cap):
    """Column tile: largest multiple of 128 (<= cap) with <=25% padding waste."""
    aligned = [_round_up(max(c, 1), 128) for c in col_sizes]
    base = sum(aligned)
    for cand in (1024, 768, 512, 384, 256, 128):
        if cand > max(cap, 128):
            continue
        waste = sum(_round_up(a, cand) - a for a in aligned)
        if 4 * waste <= base:
            return cand
    return 128


def _inner_decoder_kernel(zu_ref, zuc_ref, za_ref, edge_ref, attri_ref,
                          *, jn, activation):
    """One (TM, TN) tile of z_u @ z_u^T (j < jn) or z_u @ z_a^T (j >= jn)."""
    j = pl.program_id(1)

    def _tile(col_ref, out_ref):
        acc = lax.dot_general(
            zu_ref[...], col_ref[...],
            dimension_numbers=(((1,), (1,)), ((), ())),   # contract last dims
            preferred_element_type=jnp.float32)
        if activation is not None:
            acc = activation(acc)
        out_ref[...] = acc.astype(out_ref.dtype)

    @pl.when(j < jn)
    def _():
        _tile(zuc_ref, edge_ref)

    @pl.when(j >= jn)
    def _():
        _tile(za_ref, attri_ref)


def inner_decoder(z_u, z_a, dropout=0.0, training=False, *,
                  tm=512, tn=512, cast_to_bf16=None, out_dtype=None,
                  activation=None, vmem_limit_bytes=None):
    """Pallas implementation of InnerDecoder.forward.

    z_u: (N, D), z_a: (M, D).  Returns (edge_outputs (N*N,), attri_outputs (N*M,)).
    cast_to_bf16=None -> auto (True only on v5e); accumulation is always f32.
    activation / out_dtype are opt-in fusion levers; defaults preserve the
    exact module semantics (raw f32 logits).
    """
    del dropout, training  # p = 0.0 / eval mode -> identity

    N, D = z_u.shape
    M, Da = z_a.shape
    assert D == Da, "z_u and z_a must share the hidden dim"

    gen = _tpu_generation()
    if cast_to_bf16 is None:
        cast_to_bf16 = (gen == "v5e")          # v5e has no fast f32 MXU path
    if vmem_limit_bytes is None:
        vmem_limit_bytes = (48 << 20) if gen in ("v7x", "unknown") else (96 << 20)

    compute_dtype = jnp.bfloat16 if cast_to_bf16 else z_u.dtype
    if out_dtype is None:
        out_dtype = z_u.dtype
    in_sz = jnp.dtype(compute_dtype).itemsize
    out_sz = jnp.dtype(out_dtype).itemsize

    # Sublane packing: f32 -> 8 rows/vreg, bf16 -> 16.
    sub = {4: 8, 2: 16, 1: 32}.get(in_sz, 8)
    TM = _pick_tm(N, D, sub, tm)
    TN = _pick_tn((N, M), tn)

    # Shrink tiles if the double-buffered working set would not fit VMEM:
    # 3 streamed inputs (row tile + 2 column tiles) + 2 output tiles, x2 buffers.
    def _vmem_bytes(tm_, tn_):
        return 2 * (tm_ * D + 2 * tn_ * D) * in_sz + 4 * tm_ * tn_ * out_sz

    budget = (int(vmem_limit_bytes) * 3) // 4
    while _vmem_bytes(TM, TN) > budget and (TM > sub or TN > 128):
        if TN >= TM and TN > 128:
            TN = max(128, ((TN // 2) // 128) * 128)
        else:
            TM = max(sub, ((TM // 2) // sub) * sub)

    Np = _round_up(N, TM)     # padded output rows
    Ncp = _round_up(N, TN)    # padded edge-output columns
    Mp = _round_up(M, TN)     # padded attri-output columns
    JN, JM = Ncp // TN, Mp // TN

    zu_c = z_u.astype(compute_dtype)
    za_c = z_a.astype(compute_dtype)
    zu_rows = zu_c if Np == N else jnp.zeros((Np, D), compute_dtype).at[:N].set(zu_c)
    zu_cols = zu_c if Ncp == N else jnp.zeros((Ncp, D), compute_dtype).at[:N].set(zu_c)
    za_pad = za_c if Mp == M else jnp.zeros((Mp, D), compute_dtype).at[:M].set(za_c)

    cost = pl.CostEstimate(
        flops=int(2 * Np * (Ncp + Mp) * D),
        transcendentals=int(Np * (Ncp + Mp)) if activation is not None else 0,
        bytes_accessed=int(Np * D * in_sz                          # row operand (once)
                           + (Np // TM) * (Ncp + Mp) * D * in_sz   # column operands re-streamed per row band
                           + Np * (Ncp + Mp) * out_sz),            # two output slabs
    )

    kernel = functools.partial(_inner_decoder_kernel, jn=JN, activation=activation)

    edge_pad, attri_pad = pl.pallas_call(
        kernel,
        out_shape=(jax.ShapeDtypeStruct((Np, Ncp), out_dtype),
                   jax.ShapeDtypeStruct((Np, Mp), out_dtype)),
        grid_spec=pltpu.PrefetchScalarGridSpec(
            num_scalar_prefetch=0,
            grid=(Np // TM, JN + JM),
            in_specs=[
                # Row tile of z_u: changes only with i -> streamed once per band.
                pl.BlockSpec((TM, D), lambda i, j: (i, 0)),
                # Column tiles.  Clamped index maps keep the "other" half's
                # block resident (no redundant DMA) outside its column band.
                pl.BlockSpec((TN, D), lambda i, j: (jnp.minimum(j, JN - 1), 0)),
                pl.BlockSpec((TN, D), lambda i, j: (jnp.maximum(j - JN, 0), 0)),
            ],
            out_specs=[
                pl.BlockSpec((TM, TN), lambda i, j: (i, jnp.minimum(j, JN - 1))),
                pl.BlockSpec((TM, TN), lambda i, j: (i, jnp.maximum(j - JN, 0))),
            ],
        ),
        compiler_params=pltpu.CompilerParams(
            # Axis 1 must stay "arbitrary": its output index maps are
            # intentionally non-injective (resident-block trick).
            dimension_semantics=("parallel", "arbitrary"),
            vmem_limit_bytes=int(vmem_limit_bytes),
        ),
        cost_estimate=cost,
    )(zu_rows, zu_cols, za_pad)

    edge = edge_pad if (Np == N and Ncp == N) else edge_pad[:N, :N]
    attri = attri_pad if (Np == N and Mp == M) else attri_pad[:N, :M]
    return edge.reshape(-1), attri.reshape(-1)


if __name__ == "__main__":
    def _reference(zu, za):
        mm = functools.partial(jnp.matmul, precision=jax.lax.Precision.HIGHEST)
        return mm(zu, zu.T).reshape(-1), mm(zu, za.T).reshape(-1)

    key = jax.random.PRNGKey(0)
    k1, k2, k3, k4 = jax.random.split(key, 4)

    # Case 1: small shapes (single tile per slab), strict f32 check.
    N, M, D = 8, 16, 32
    z_u = jax.random.normal(k1, (N, D), dtype=jnp.float32)
    z_a = jax.random.normal(k2, (M, D), dtype=jnp.float32)
    edge_out, attri_out = inner_decoder(z_u, z_a, cast_to_bf16=False)
    jax.block_until_ready((edge_out, attri_out))
    edge_ref, attri_ref = _reference(z_u, z_a)
    assert edge_out.shape == (N * N,) and attri_out.shape == (N * M,)
    assert jnp.allclose(edge_out, edge_ref, atol=1e-5, rtol=1e-5)
    assert jnp.allclose(attri_out, attri_ref, atol=1e-5, rtol=1e-5)

    # Same shapes with per-generation defaults (bf16 inputs auto on v5e):
    # loose tolerance covers bf16 input rounding; exact on f32 generations.
    edge_d, attri_d = inner_decoder(z_u, z_a)
    jax.block_until_ready((edge_d, attri_d))
    assert jnp.allclose(edge_d, edge_ref, atol=0.5, rtol=5e-2)
    assert jnp.allclose(attri_d, attri_ref, atol=0.5, rtol=5e-2)

    # Case 2: awkward sizes (multiple column tiles for both outputs, padded
    # rows/columns sliced away), strict f32 check.
    N2, M2, D2 = 200, 72, 48
    z_u2 = jax.random.normal(k3, (N2, D2), dtype=jnp.float32)
    z_a2 = jax.random.normal(k4, (M2, D2), dtype=jnp.float32)
    edge2, attri2 = inner_decoder(z_u2, z_a2, cast_to_bf16=False)
    jax.block_until_ready((edge2, attri2))
    edge_ref2, attri_ref2 = _reference(z_u2, z_a2)
    assert edge2.shape == (N2 * N2,) and attri2.shape == (N2 * M2,)
    assert jnp.allclose(edge2, edge_ref2, atol=1e-4, rtol=1e-4)
    assert jnp.allclose(attri2, attri_ref2, atol=1e-4, rtol=1e-4)

    print("KERNEL_OK")
</pallas_src>

<mosaic_0001>
module attributes {stable_mosaic.version = 11 : i64} {
  func.func @_inner_decoder_kernel(%arg0: i32, %arg1: i32, %arg2: memref<8x32xf32, #tpu.memory_space<vmem>>, %arg3: memref<128x32xf32, #tpu.memory_space<vmem>>, %arg4: memref<128x32xf32, #tpu.memory_space<vmem>>, %arg5: memref<8x128xf32, #tpu.memory_space<vmem>>, %arg6: memref<8x128xf32, #tpu.memory_space<vmem>>) attributes {dimension_semantics = [#tpu.dimension_semantics<parallel>, #tpu.dimension_semantics<arbitrary>], iteration_bounds = array<i64: 1, 2>, scalar_prefetch = 0 : i64, scratch_operands = 0 : i64, tpu.core_type = #tpu.core_type<tc>, window_params = [{transform_indices = @transform_0, window_bounds = array<i64: 8, 32>}, {transform_indices = @transform_1, window_bounds = array<i64: 128, 32>}, {transform_indices = @transform_2, window_bounds = array<i64: 128, 32>}, {transform_indices = @transform_3, window_bounds = array<i64: 8, 128>}, {transform_indices = @transform_4, window_bounds = array<i64: 8, 128>}]} {
    %c1_i32 = arith.constant 1 : i32
    %0 = arith.cmpi slt, %arg1, %c1_i32 : i32
    %1 = arith.extui %0 : i1 to i32
    %c0_i32 = arith.constant 0 : i32
    %2 = arith.cmpi ne, %1, %c0_i32 : i32
    scf.if %2 {
      %c0 = arith.constant 0 : index
      %c0_2 = arith.constant 0 : index
      %6 = vector.load %arg2[%c0, %c0_2] : memref<8x32xf32, #tpu.memory_space<vmem>>, vector<8x32xf32>
      %c0_3 = arith.constant 0 : index
      %c0_4 = arith.constant 0 : index
      %7 = vector.load %arg3[%c0_3, %c0_4] : memref<128x32xf32, #tpu.memory_space<vmem>>, vector<128x32xf32>
      %cst = arith.constant dense<0.000000e+00> : vector<8x128xf32>
      %8 = tpu.matmul %6, %7, %cst {dimension_numbers = #tpu.dot_dimension_numbers<[1], [1], [0], [0], [0, 0, 1, 0], [], []>} : vector<8x32xf32>, vector<128x32xf32>, vector<8x128xf32> -> vector<8x128xf32>
      %c0_5 = arith.constant 0 : index
      %c0_6 = arith.constant 0 : index
      %9 = vector.load %arg5[%c0_5, %c0_6] : memref<8x128xf32, #tpu.memory_space<vmem>>, vector<8x128xf32>
      tpu.vector_store %arg5[%c0_5, %c0_6], %8 {strides = array<i32>} : memref<8x128xf32, #tpu.memory_space<vmem>>, vector<8x128xf32>,
    } else {
    }
    %c1_i32_0 = arith.constant 1 : i32
    %3 = arith.cmpi sge, %arg1, %c1_i32_0 : i32
    %4 = arith.extui %3 : i1 to i32
    %c0_i32_1 = arith.constant 0 : i32
    %5 = arith.cmpi ne, %4, %c0_i32_1 : i32
    scf.if %5 {
      %c0 = arith.constant 0 : index
      %c0_2 = arith.constant 0 : index
      %6 = vector.load %arg2[%c0, %c0_2] : memref<8x32xf32, #tpu.memory_space<vmem>>, vector<8x32xf32>
      %c0_3 = arith.constant 0 : index
      %c0_4 = arith.constant 0 : index
      %7 = vector.load %arg4[%c0_3, %c0_4] : memref<128x32xf32, #tpu.memory_space<vmem>>, vector<128x32xf32>
      %cst = arith.constant dense<0.000000e+00> : vector<8x128xf32>
      %8 = tpu.matmul %6, %7, %cst {dimension_numbers = #tpu.dot_dimension_numbers<[1], [1], [0], [0], [0, 0, 1, 0], [], []>} : vector<8x32xf32>, vector<128x32xf32>, vector<8x128xf32> -> vector<8x128xf32>
      %c0_5 = arith.constant 0 : index
      %c0_6 = arith.constant 0 : index
      %9 = vector.load %arg6[%c0_5, %c0_6] : memref<8x128xf32, #tpu.memory_space<vmem>>, vector<8x128xf32>
      tpu.vector_store %arg6[%c0_5, %c0_6], %8 {strides = array<i32>} : memref<8x128xf32, #tpu.memory_space<vmem>>, vector<8x128xf32>,
    } else {
    }
    return
  }
  func.func @transform_0(%arg0: i32, %arg1: i32) -> (i32, i32) {
    %c0_i32 = arith.constant 0 : i32
    %c0_i32_0 = arith.constant 0 : i32
    return %arg0, %c0_i32 : i32, i32
  }
  func.func @transform_1(%arg0: i32, %arg1: i32) -> (i32, i32) {
    %c0_i32 = arith.constant 0 : i32
    %0 = arith.minsi %arg1, %c0_i32 : i32
    %c0_i32_0 = arith.constant 0 : i32
    %c0_i32_1 = arith.constant 0 : i32
    return %0, %c0_i32_0 : i32, i32
  }
  func.func @transform_2(%arg0: i32, %arg1: i32) -> (i32, i32) {
    %c1_i32 = arith.constant 1 : i32
    %0 = arith.subi %arg1, %c1_i32 : i32
    %c0_i32 = arith.constant 0 : i32
    %1 = arith.maxsi %0, %c0_i32 : i32
    %c0_i32_0 = arith.constant 0 : i32
    %c0_i32_1 = arith.constant 0 : i32
    return %1, %c0_i32_0 : i32, i32
  }
  func.func @transform_3(%arg0: i32, %arg1: i32) -> (i32, i32) {
    %c0_i32 = arith.constant 0 : i32
    %0 = arith.minsi %arg1, %c0_i32 : i32
    %c0_i32_0 = arith.constant 0 : i32
    return %arg0, %0 : i32, i32
  }
  func.func @transform_4(%arg0: i32, %arg1: i32) -> (i32, i32) {
    %c1_i32 = arith.constant 1 : i32
    %0 = arith.subi %arg1, %c1_i32 : i32
    %c0_i32 = arith.constant 0 : i32
    %1 = arith.maxsi %0, %c0_i32 : i32
    %c0_i32_0 = arith.constant 0 : i32
    return %arg0, %1 : i32, i32
  }
}

</mosaic_0001>

<bundles_post_ra>
// kernel: tpu_custom_call.1
= control target key start
LH: loop header
LB: loop body
LE: loop exit
PB: predicated region body
PF: predicated region fallthrough
CT: control target
= control target key end

     0   :  { %10 = vsyncpa [#allocation3], 0  ;;  %s1515_s0 = inlined_call_operand.vmem [shape: f32[8,32], index: 0, kind: input, shape index: {}]   ;;  %s1516_s1 = inlined_call_operand.vmem [shape: f32[128,32], index: 1, kind: input, shape index: {}]   ;;  %s1517_s2 = inlined_call_operand.vmem [shape: f32[128,32], index: 2, kind: input, shape index: {}]   ;;  %s1518_s3 = inlined_call_operand.hbm [shape: f32[8,128], index: 3, kind: output, shape index: {0}]   ;;  %s1519_s4 = inlined_call_operand.hbm [shape: f32[8,128], index: 4, kind: output, shape index: {1}]  }
   0x1   :  { %12 = vsyncpa [#allocation3 + $0x1], 0 }
   0x2   :  { %13 = vsyncpa [#allocation5], 0 }
   0x3   :  { %15 = vsyncpa [#allocation5 + $0x1], 0  ;;  %s1250_s15 = smov 0   ;;  %s1252_s16 = smov 0  }
   0x4   :  { %s1254_s17 = smov 0   ;;  %s1256_s18 = smov 0  }
   0x5   :  { %s1258_s19 = smov 0   ;;  %s1260_s20 = smov 0  }
   0x6   :  { %s1262_s21 = smov 0  }
   0x7 LB: > { %1523 = sst [smem:[#allocation8_spill]] %s1211_s20  ;;  %s769_s22 = sadd.s32 4294967295, %s1215_s21   ;;  %s1215_s21 = sphi %s1262_s21, %s21_s21   ;;  %s1211_s20 = sphi %s1260_s20, %s1536_s20   ;;  %s1207_s19 = sphi %s1258_s19, %s1535_s19   ;;  %s1203_s18 = sphi %s1256_s18, %s1505_s18   ;;  %s1199_s17 = sphi %s1254_s17, %s1538_s17   ;;  %s1195_s16 = sphi %s1252_s16, %s1500_s16   ;;  %s1191_s15 = sphi %s1250_s15, %s1537_s15  }
   0x8   : > { %s770_s23 = sadd.s32 4294967294, %s1215_s21   ;;  %s30_s24 = sadd.s32 1, %s1211_s20 }
   0x9   : > { %p31_p0 = scmp.ge.s32.totalorder %s30_s24, 2  ;;  %p1187_p1 = scmp.ne.s32.totalorder %s1203_s18, 0 }
   0xa   : > { %p145_p2 = scmp.eq.s32.totalorder %s769_s22, 1  ;;  %p150_p3 = scmp.ne.s32.totalorder %s1203_s18, %s1199_s17 }
   0xb   : > { %s1540_s24 = smov (%p31_p0, %s30_s24), 0  ;;  %p151_p5 = scmp.eq.s32.totalorder %s770_s23, 1 }
   0xc   : > { %1524 = sst [smem:[#allocation9_spill]] %s1540_s24  ;;  %p1293_p4 = por %p1187_p1, %p145_p2 }
   0xd   : > { %p1297_p6 = por %p151_p5, %p150_p3  ;;  %p1188_p7 = scmp.ne.s32.totalorder %s1195_s16, 0 }
   0xe   : > { %p184_p8 = scmp.ne.s32.totalorder %s1195_s16, %s1191_s15  ;;  %p778_p11 = scmp.ge.s32.totalorder %s1215_s21, 1 }
   0xf   : > { %p1304_p9 = por %p1188_p7, %p145_p2  ;;  %p238_p12 = scmp.lt.s32.totalorder %s1215_s21, 3 }
  0x10   : > { %p1308_p10 = por %p184_p8, %p151_p5 }
  0x11   : > { %p239_p13 = pnand %p778_p11, %p238_p12 }
  0x12   : > { %s1521_s29 = sand.u32 (!%p239_p13), 1, %s1203_s18   ;;  %s1520_s30 = sand.u32 (!%p239_p13), 1, %s1195_s16  }
  0x13   : > { %242 = sbr.rel (%p239_p13) target bundleno = 643 (0x283), region = 32  ;;  %s1318_s5 = sshll.u32 (!%p239_p13), %s1521_s29, 3 }
  0x14   : > { %s1322_s6 = sshll.u32 (!%p239_p13), %s1520_s30, 3  ;;  %p287_p0 = scmp.lt.s32.totalorder (!%p239_p13), %s1207_s19, 0 }
  0x15   : > { %s783_s7 = sadd.s32 (!%p239_p13), 4294967295, %s1207_s19  ;;  %s275_s24 = scalar_lea.vmem (!%p239_p13), [#allocation2], %s1318_s5 }
  0x16   : > { %p298_p1 = scmp.gt.s32.totalorder (!%p239_p13), %s783_s7, 0  ;;  %s282_s20 = scalar_lea.vmem (!%p239_p13), [#allocation4], %s1322_s6 }
  0x17   : > { %p786_p5 = scmp.ge.s32.totalorder (!%p239_p13), %s1207_s19, 1 }
  0x1a   : > { %s1327_s8 = scalar_select %p287_p0, %s1207_s19, 0 }
  0x1b   : > { %s1542_s7 = smov (!%p298_p1, %s783_s7), 0  ;;  %317 = sbr.rel (%p786_p5) target bundleno = 313 (0x139), region = 36 }
  0x1c   : > { %s781_s9 = sshll.u32 %s1327_s8, 4  ;;  %s784_s10 = sshll.u32 %s1542_s7, 4  ;;  %vm335_vm0 = vcmask (!%p786_p5), 261120   ;;  %v1217_v2 = vmov (!%p786_p5), 0.0|0.0   ;;  %vm1218_vm2 = vmmov (!%p786_p5), 0   ;;  %v1219_v5 = vmov (!%p786_p5), 0.0  }
  0x1d   : > { %p290_p2 = scmp.lt.s32.totalorder %s781_s9, 15  ;;  %p301_p3 = scmp.lt.s32.totalorder %s784_s10, 15  ;;  %933 = vmatprep.subr.bf16.mxu0 (!%p786_p5), %v1217_v2  ;;  %vm1350_vm1 = vmpackc.low (!%p786_p5), %vm335_vm0, %vm335_vm0  ;;  %895 = vmatprep.mubr.msk.f32.mxu0 (!%p786_p5), %vm1218_vm2, %v1219_v5  ;;  %v318_v27 = vld [vmem:[%s1515_s0] sm:$0xff] (!%p786_p5) }
  0x1f   : > { %s1544_s9 = smov (!%p290_p2, %s781_s9), 15  ;;  %s1546_s10 = smov (!%p301_p3, %s784_s10), 15 }
  0x20   : > { %s782_s11 = sshll.u32 %s1544_s9, 3  ;;  %s785_s22 = sshll.u32 %s1546_s10, 3 }
  0x21   : > { %s1336_s14 = scalar_lea.vmem %s1516_s1, %s782_s11  ;;  %s1341_s29 = scalar_lea.vmem %s1517_s2, %s785_s22 }
  0x22   : > { %v319_v0 = vld [vmem:[%s1336_s14] sm:$0xff]  ;;  %v320_v1 = vld [vmem:[%s1336_s14 + $0x8] sm:$0xff]  ;;  %v321_v6 = vld [vmem:[%s1336_s14 + $0x10] sm:$0xff] }
  0x23   : > { %v934_v3 = vpack.c.bf16 %v320_v1, %v319_v0  ;;  %v322_v7 = vld [vmem:[%s1336_s14 + $0x18] sm:$0xff]  ;;  %v323_v9 = vld [vmem:[%s1336_s14 + $0x20] sm:$0xff]  ;;  %v324_v10 = vld [vmem:[%s1336_s14 + $0x28] sm:$0xff] }
  0x24   : > { %v938_v8 = vpack.c.bf16 %v322_v7, %v321_v6  ;;  %v942_v11 = vpack.c.bf16 %v324_v10, %v323_v9  ;;  %v325_v12 = vld [vmem:[%s1336_s14 + $0x30] sm:$0xff]  ;;  %v326_v13 = vld [vmem:[%s1336_s14 + $0x38] sm:$0xff]  ;;  %v327_v15 = vld [vmem:[%s1336_s14 + $0x40] sm:$0xff] }
  0x25   : > { %936 = vmatpush3.bf16.xpose.msk.msra.mxu0 %vm1350_vm1, %v934_v3  ;;  %v946_v14 = vpack.c.bf16 %v326_v13, %v325_v12  ;;  %v328_v16 = vld [vmem:[%s1336_s14 + $0x48] sm:$0xff]  ;;  %v329_v18 = vld [vmem:[%s1336_s14 + $0x50] sm:$0xff]  ;;  %v330_v19 = vld [vmem:[%s1336_s14 + $0x58] sm:$0xff] }
  0x26   : > { %937 = vmatprep.subr.bf16.mxu0 %v1217_v2  ;;  %v950_v17 = vpack.c.bf16 %v328_v16, %v327_v15  ;;  %v954_v20 = vpack.c.bf16 %v330_v19, %v329_v18  ;;  %v331_v21 = vld [vmem:[%s1336_s14 + $0x60] sm:$0xff]  ;;  %v332_v22 = vld [vmem:[%s1336_s14 + $0x68] sm:$0xff]  ;;  %v333_v24 = vld [vmem:[%s1336_s14 + $0x70] sm:$0xff] }
  0x27   : > { %v958_v23 = vpack.c.bf16 %v332_v22, %v331_v21  ;;  %v334_v25 = vld [vmem:[%s1336_s14 + $0x78] sm:$0xff] }
  0x28   : > { %v962_v26 = vpack.c.bf16 %v334_v25, %v333_v24 }
  0x2d   : > { %940 = vmatpush3.bf16.xpose.msk.msra.mxu0 %vm1350_vm1, %v938_v8 }
  0x2e   : > { %941 = vmatprep.subr.bf16.mxu0 %v1217_v2 }
  0x35   : > { %944 = vmatpush3.bf16.xpose.msk.msra.mxu0 %vm1350_vm1, %v942_v11 }
  0x36   : > { %945 = vmatprep.subr.bf16.mxu0 %v1217_v2 }
  0x3d   : > { %948 = vmatpush3.bf16.xpose.msk.msra.mxu0 %vm1350_vm1, %v946_v14 }
  0x3e   : > { %949 = vmatprep.subr.bf16.mxu0 %v1217_v2 }
  0x45   : > { %952 = vmatpush3.bf16.xpose.msk.msra.mxu0 %vm1350_vm1, %v950_v17 }
  0x46   : > { %953 = vmatprep.subr.bf16.mxu0 %v1217_v2 }
  0x4d   : > { %956 = vmatpush3.bf16.xpose.msk.msra.mxu0 %vm1350_vm1, %v954_v20 }
  0x4e   : > { %957 = vmatprep.subr.bf16.mxu0 %v1217_v2 }
  0x55   : > { %960 = vmatpush3.bf16.xpose.msk.msra.mxu0 %vm1350_vm1, %v958_v23 }
  0x56   : > { %961 = vmatprep.subr.bf16.mxu0 %v1217_v2 }
  0x5d   : > { %964 = vmatpush3.bf16.xpose.msk.msra.mxu0 %vm1350_vm1, %v962_v26 }
  0x64   : > { %896 = vmatmul.mubr.msk.f32.vlgmr.msra.gmra.mrb[0].mxu0 %vm335_vm0, %v318_v27 }
 0x137   : > { %v453_v28 = vpop.f32.mrb[0].mxu0 }
 0x138   : > { %457 = vst [vmem:[%s275_s24] sm:$0xff] %v453_v28  ;;  %v897_v29 = vpop.f32.mrb[1].mxu0 }
 0x139 PF: > { %p804_p7 = scmp.lt.s32.totalorder %s1207_s19, 1 }
 0x13a   : > { %v463_v30 = vld [vmem:[%s1341_s29] sm:$0xff] (!%p804_p7)  ;;  %v464_v31 = vld [vmem:[%s1341_s29 + $0x8] sm:$0xff] (!%p804_p7)  ;;  %vm479_vm3 = vcmask (!%p804_p7), 261120   ;;  %v1220_v32 = vmov (!%p804_p7), 0.0|0.0   ;;  %vm1221_vm5 = vmmov (!%p804_p7), 0   ;;  %v1222_v35 = vmov (!%p804_p7), 0.0  }
 0x13b   : > { %461 = sbr.rel (%p804_p7) target bundleno = 593 (0x251), region = 40  ;;  %965 = vmatprep.subr.bf16.mxu0 (!%p804_p7), %v1220_v32  ;;  %v966_v33 = vpack.c.bf16 (!%p804_p7), %v464_v31, %v463_v30  ;;  %vm1395_vm4 = vmpackc.low (!%p804_p7), %vm479_vm3, %vm479_vm3  ;;  %930 = vmatprep.mubr.msk.f32.mxu0 (!%p804_p7), %vm1221_vm5, %v1222_v35  ;;  %v465_v36 = vld [vmem:[%s1341_s29 + $0x10] sm:$0xff] (!%p804_p7)  ;;  %v466_v37 = vld [vmem:[%s1341_s29 + $0x18] sm:$0xff] (!%p804_p7) }
 0x13c   : > { %v970_v38 = vpack.c.bf16 (!%p804_p7), %v466_v37, %v465_v36  ;;  %v467_v39 = vld [vmem:[%s1341_s29 + $0x20] sm:$0xff] (!%p804_p7)  ;;  %v468_v40 = vld [vmem:[%s1341_s29 + $0x28] sm:$0xff] (!%p804_p7)  ;;  %v469_v42 = vld [vmem:[%s1341_s29 + $0x30] sm:$0xff] (!%p804_p7) }
 0x13d   : > { %968 = vmatpush3.bf16.xpose.msk.msra.mxu0 (!%p804_p7), %vm1395_vm4, %v966_v33  ;;  %v974_v41 = vpack.c.bf16 (!%p804_p7), %v468_v40, %v467_v39  ;;  %v470_v43 = vld [vmem:[%s1341_s29 + $0x38] sm:$0xff] (!%p804_p7)  ;;  %v471_v45 = vld [vmem:[%s1341_s29 + $0x40] sm:$0xff] (!%p804_p7)  ;;  %v472_v46 = vld [vmem:[%s1341_s29 + $0x48] sm:$0xff] (!%p804_p7) }
 0x13e   : > { %969 = vmatprep.subr.bf16.mxu0 (!%p804_p7), %v1220_v32  ;;  %v978_v44 = vpack.c.bf16 (!%p804_p7), %v470_v43, %v469_v42  ;;  %v982_v47 = vpack.c.bf16 (!%p804_p7), %v472_v46, %v471_v45  ;;  %v473_v48 = vld [vmem:[%s1341_s29 + $0x50] sm:$0xff] (!%p804_p7)  ;;  %v474_v49 = vld [vmem:[%s1341_s29 + $0x58] sm:$0xff] (!%p804_p7)  ;;  %v475_v51 = vld [vmem:[%s1341_s29 + $0x60] sm:$0xff] (!%p804_p7) }
 0x13f   : > { %v986_v50 = vpack.c.bf16 (!%p804_p7), %v474_v49, %v473_v48  ;;  %v476_v52 = vld [vmem:[%s1341_s29 + $0x68] sm:$0xff] (!%p804_p7)  ;;  %v477_v54 = vld [vmem:[%s1341_s29 + $0x70] sm:$0xff] (!%p804_p7)  ;;  %v478_v55 = vld [vmem:[%s1341_s29 + $0x78] sm:$0xff] (!%p804_p7) }
 0x140   : > { %v990_v53 = vpack.c.bf16 (!%p804_p7), %v476_v52, %v475_v51  ;;  %v994_v56 = vpack.c.bf16 (!%p804_p7), %v478_v55, %v477_v54  ;;  %v462_v57 = vld [vmem:[%s1515_s0] sm:$0xff] (!%p804_p7) }
 0x145   : > { %972 = vmatpush3.bf16.xpose.msk.msra.mxu0 %vm1395_vm4, %v970_v38 }
 0x146   : > { %973 = vmatprep.subr.bf16.mxu0 %v1220_v32 }
 0x14d   : > { %976 = vmatpush3.bf16.xpose.msk.msra.mxu0 %vm1395_vm4, %v974_v41 }
 0x14e   : > { %977 = vmatprep.subr.bf16.mxu0 %v1220_v32 }
 0x155   : > { %980 = vmatpush3.bf16.xpose.msk.msra.mxu0 %vm1395_vm4, %v978_v44 }
 0x156   : > { %981 = vmatprep.subr.bf16.mxu0 %v1220_v32 }
 0x15d   : > { %984 = vmatpush3.bf16.xpose.msk.msra.mxu0 %vm1395_vm4, %v982_v47 }
 0x15e   : > { %985 = vmatprep.subr.bf16.mxu0 %v1220_v32 }
 0x165   : > { %988 = vmatpush3.bf16.xpose.msk.msra.mxu0 %vm1395_vm4, %v986_v50 }
 0x166   : > { %989 = vmatprep.subr.bf16.mxu0 %v1220_v32 }
 0x16d   : > { %992 = vmatpush3.bf16.xpose.msk.msra.mxu0 %vm1395_vm4, %v990_v53 }
 0x16e   : > { %993 = vmatprep.subr.bf16.mxu0 %v1220_v32 }
 0x175   : > { %996 = vmatpush3.bf16.xpose.msk.msra.mxu0 %vm1395_vm4, %v994_v56 }
 0x17c   : > { %931 = vmatmul.mubr.msk.f32.vlgmr.msra.gmra.mrb[0].mxu0 %vm479_vm3, %v462_v57 }
 0x24f   : > { %v597_v58 = vpop.f32.mrb[0].mxu0 }
 0x250   : > { %601 = vst [vmem:[%s282_s20] sm:$0xff] %v597_v58  ;;  %v932_v59 = vpop.f32.mrb[1].mxu0 }
 0x251 PF: > { %s824_s29 = sshll.u32 %s1327_s8, 7  ;;  %s624_s14 = sshll.u32 %s275_s24, 4  ;;  %s625_s14 = int_to_ptr.vmem [resolvable:$true] %s624_s14 }
 0x252   : > { %s1439_s13 = scalar_lea.hbm %s1518_s3, %s824_s29  ;;  %s1533_s22 = sand.u32 1, %s1203_s18  }
 0x253   : > { %s603_s23 = scalar_lea.sflag [#allocation3], %s1533_s22  ;;  %s1087_s30 = scalar_lea.vmem %s625_s14, 128 }
 0x254   : > { %p1088_p8 = scmp.ne.s32.totalorder %s625_s14, %s1087_s30  ;;  %s1223_s9 = smov [#allocation2]  }
 0x255   : > { %s1091_s19 = sshll.u32 %s1223_s9, 4  ;;  %s1092_s19 = int_to_ptr.vmem [resolvable:$false] %s1091_s19 }
 0x256   : > { %p1089_p11 = pnand %p1088_p8, %p1293_p4  ;;  %s1093_s10 = scalar_lea.vmem %s1092_s19, 256 }
 0x257   : > { %p1094_p13 = scmp.lt.s32.totalorder %s625_s14, %s1092_s19  ;;  %p1095_p0 = scmp.lt.s32.totalorder %s1093_s10, %s1087_s30 }
 0x258   : > { %p1090_p12 = pneg %p1089_p11 }
 0x259   : > { %p1096_p1 = por %p1095_p0, %p1094_p13 }
 0x25b   : > { %p1097_p2 = pnand %p1096_p1, %p1090_p12 }
 0x25d   : > { %1100 = shalt.err (!%p1097_p2)
}
 0x25e   : > { %s1101_s24 = scalar_lea.hbm %s1439_s13, 128  ;;  %s1105_s29 = scalar_lea.hbm %s1518_s3, 128 }
 0x25f   : > { %p1102_p3 = scmp.ne.s32.totalorder %s1439_s13, %s1101_s24  ;;  %p1106_p8 = scmp.lt.u32.totalorder %s1439_s13, %s1518_s3 }
 0x260   : > { %p1107_p11 = scmp.lt.u32.totalorder %s1105_s29, %s1101_s24  ;;  %p1109_p13 = scmp.lt.u32.totalorder %s1101_s24, %s1439_s13 }
 0x261   : > { %p1103_p5 = pnand %p1102_p3, %p1293_p4 }
 0x262   : > { %p1108_p12 = por %p1107_p11, %p1106_p8 }
 0x263   : > { %p1104_p7 = pneg %p1103_p5 }
 0x264   : > { %p1110_p0 = por %p1109_p13, %p1108_p12 }
 0x266   : > { %p1111_p1 = pnand %p1110_p0, %p1104_p7 }
 0x268   : > { %1114 = shalt.err (!%p1111_p1)
}
 0x269   : > { %997 = dma.vmem_to_hbm [thread:$0]  (%p1293_p4), %s625_s14, 128, %s1439_s13, %s603_s23  }
 0x26a   : > { %s826_s22 = sshll.u32 %s1542_s7, 7  ;;  %s641_s30 = sshll.u32 %s282_s20, 4  ;;  %s642_s30 = int_to_ptr.vmem [resolvable:$true] %s641_s30 }
 0x26b   : > { %s1468_s10 = scalar_lea.hbm %s1519_s4, %s826_s22  ;;  %s1534_s24 = sand.u32 1, %s1195_s16  }
 0x26c   : > { %s608_s5 = scalar_lea.sflag [#allocation5], %s1534_s24  ;;  %s1115_s8 = scalar_lea.vmem %s642_s30, 128 }
 0x26d   : > { %p1116_p2 = scmp.ne.s32.totalorder %s642_s30, %s1115_s8  ;;  %s1224_s25 = smov [#allocation4]  }
 0x26e   : > { %s1119_s29 = sshll.u32 %s1224_s25, 4  ;;  %s1120_s29 = int_to_ptr.vmem [resolvable:$false] %s1119_s29 }
 0x26f   : > { %p1117_p3 = pnand %p1116_p2, %p1304_p9  ;;  %s1121_s13 = scalar_lea.vmem %s1120_s29, 256 }
 0x270   : > { %p1122_p4 = scmp.lt.s32.totalorder %s642_s30, %s1120_s29  ;;  %p1123_p7 = scmp.lt.s32.totalorder %s1121_s13, %s1115_s8 }
 0x271   : > { %p1118_p5 = pneg %p1117_p3 }
 0x272   : > { %p1124_p8 = por %p1123_p7, %p1122_p4 }
 0x274   : > { %p1125_p11 = pnand %p1124_p8, %p1118_p5 }
 0x276   : > { %1128 = shalt.err (!%p1125_p11)
}
 0x277   : > { %s1129_s20 = scalar_lea.hbm %s1468_s10, 128  ;;  %s1133_s14 = scalar_lea.hbm %s1519_s4, 128 }
 0x278   : > { %p1130_p12 = scmp.ne.s32.totalorder %s1468_s10, %s1129_s20  ;;  %p1134_p1 = scmp.lt.u32.totalorder %s1468_s10, %s1519_s4 }
 0x279   : > { %p1135_p2 = scmp.lt.u32.totalorder %s1133_s14, %s1129_s20  ;;  %p1137_p5 = scmp.lt.u32.totalorder %s1129_s20, %s1468_s10 }
 0x27a   : > { %p1131_p13 = pnand %p1130_p12, %p1304_p9 }
 0x27b   : > { %p1136_p3 = por %p1135_p2, %p1134_p1 }
 0x27c   : > { %p1132_p0 = pneg %p1131_p13 }
 0x27d   : > { %p1138_p4 = por %p1137_p5, %p1136_p3 }
 0x27f   : > { %p1139_p7 = pnand %p1138_p4, %p1132_p0 }
 0x281   : > { %1142 = shalt.err (!%p1139_p7)
}
 0x282   : > { %998 = dma.vmem_to_hbm [thread:$0]  (%p1304_p9), %s642_s30, 128, %s1468_s10, %s608_s5  }
 0x283 PF: > { %p1008_p8 = scmp.ge.s32.totalorder %s1215_s21, 2  ;;  %s653_s12 = sand.u32 1, %s1199_s17  }
 0x284   : > { %s654_s22 = scalar_lea.sflag [#allocation3], %s653_s12 }
 0x285   : > { %p1002_p11 = pnand %p1008_p8, %p1297_p6 }
 0x287   : > { %1180 = dma.done.wait (!%p1002_p11), %s654_s22, 128  }
 0x288   : > { %1182 = vsyncadd (!%p1002_p11), %s654_s22, 4294967168  ;;  %s662_s9 = sand.u32 1, %s1191_s15   ;;  %p1005_p12 = pnand %p1008_p8, %p1308_p10 }
 0x289   : > { %s663_s19 = scalar_lea.sflag [#allocation5], %s662_s9 }
 0x28a   : > { %1184 = dma.done.wait (!%p1005_p12), %s663_s19, 128  }
 0x28b   : > { %1186 = vsyncadd (!%p1005_p12), %s663_s19, 4294967168  ;;  %s21_s21 = sadd.s32 1, %s1215_s21   ;;  %s1535_s19 = sld [smem:[#allocation8_spill]] }
 0x28c   : > { %p18_p9 = scmp.ge.s32.totalorder %s21_s21, 4   ;;  %s1536_s20 = sld [smem:[#allocation9_spill]] }
 0x28d   : > { %s1537_s15 = smov %s1195_s16  ;;  %s1500_s16 = smov 0  }
 0x28e   : > { %s1538_s17 = smov %s1203_s18  ;;  %s1505_s18 = smov 0  }
 0x28f   :  { %20 = sbr.rel (!%p18_p9) target bundleno = 7 (0x7), region = 98 }
 0x296   :  { %668 = vsyncpa [#allocation3], 1 }
 0x297   :  { %670 = vsyncpa [#allocation3 + $0x1], 1 }
 0x298   :  { %671 = vsyncpa [#allocation5], 1 }
 0x299   :  { %673 = vsyncpa [#allocation5 + $0x1], 1 }

</bundles_post_ra>
